<compile_context>
chip_gen: v6e
topology: v6e:2x2x1
jax: 0.10.0
libtpu: 0.0.40
codegen_flags: <defaults>
</compile_context>

<pallas_src>
import jax
import jax.numpy as jnp
from jax.experimental import pallas as pl
from jax.experimental.pallas import tpu as pltpu

LANE = 512        # lane-dense last dim (multiple of 128)
BLOCK_ROWS = 512  # 512 * 512 * 4 B = 1 MiB per f32 block buffer


# ----------------------------------------------------------------------------
# Pallas kernel
# ----------------------------------------------------------------------------
def mod_softplus3_kernel(x_ref, o_ref):
    """x_ref/o_ref: VMEM (block_rows, LANE) tiles of the flattened input."""
    x = x_ref[...].astype(jnp.float32)
    neg_abs = -jnp.abs(x)
    # relu(x) + softplus(-|x|); exp argument is <= 0 so no overflow and the
    # torch softplus threshold (20) branch is never taken.
    out = jnp.maximum(x, 0.0) + jnp.log1p(jnp.exp(neg_abs))
    o_ref[...] = out.astype(o_ref.dtype)


# ----------------------------------------------------------------------------
# Wrapper
# ----------------------------------------------------------------------------
@jax.jit
def mod_softplus3(x):
    """Elementwise relu(x) + softplus(-|x|), same shape/dtype as x."""
    orig_shape = x.shape
    orig_dtype = x.dtype

    flat = x.reshape(-1)
    n = flat.shape[0]

    # Round up to a whole number of lanes.
    rows = (n + LANE - 1) // LANE

    if rows <= BLOCK_ROWS:
        block_rows = rows                      # single full-extent block
        padded_rows = rows
    else:
        block_rows = BLOCK_ROWS
        padded_rows = ((rows + BLOCK_ROWS - 1) // BLOCK_ROWS) * BLOCK_ROWS

    n_pad = padded_rows * LANE
    if n_pad != n:                             # pad only when actually needed
        flat = jnp.pad(flat, (0, n_pad - n))
    x2d = flat.reshape(padded_rows, LANE)

    grid = (padded_rows // block_rows,)

    out2d = pl.pallas_call(
        mod_softplus3_kernel,
        out_shape=jax.ShapeDtypeStruct((padded_rows, LANE), orig_dtype),
        grid=grid,
        in_specs=[pl.BlockSpec((block_rows, LANE), lambda i: (i, 0))],
        out_specs=pl.BlockSpec((block_rows, LANE), lambda i: (i, 0)),
        compiler_params=pltpu.CompilerParams(
            dimension_semantics=("parallel",)
        ),
    )(x2d)

    out_flat = out2d.reshape(-1)
    if n_pad != n:                             # slice only when padding happened
        out_flat = out_flat[:n]
    return out_flat.reshape(orig_shape)


# ----------------------------------------------------------------------------
# Pure-JAX reference (mirrors torch: F.relu(x) + F.softplus(-|x|))
# ----------------------------------------------------------------------------
def _reference(x):
    xf = x.astype(jnp.float32)
    ref = jax.nn.relu(xf) + jax.nn.softplus(-jnp.abs(xf))
    return ref.astype(x.dtype)


if __name__ == "__main__":
    key = jax.random.PRNGKey(0)

    # Input: NCHW [2, 4, 16, 16] float32
    x = jax.random.normal(key, (2, 4, 16, 16), dtype=jnp.float32)

    out = mod_softplus3(x)
    out = jax.block_until_ready(out)

    assert out.shape == x.shape, (out.shape, x.shape)
    assert out.dtype == x.dtype, (out.dtype, x.dtype)

    ref = _reference(x)
    assert jnp.allclose(out, ref, atol=1e-5, rtol=1e-5), (
        float(jnp.max(jnp.abs(out - ref)))
    )

    print("KERNEL_OK")
</pallas_src>

<mosaic_0001>
module attributes {stable_mosaic.version = 11 : i64} {
  func.func @mod_softplus3_kernel(%arg0: i32, %arg1: memref<4x512xf32, #tpu.memory_space<vmem>>, %arg2: memref<4x512xf32, #tpu.memory_space<vmem>>) attributes {dimension_semantics = [#tpu.dimension_semantics<parallel>], iteration_bounds = array<i64: 1>, scalar_prefetch = 0 : i64, scratch_operands = 0 : i64, tpu.core_type = #tpu.core_type<tc>, window_params = [{transform_indices = @transform_0, window_bounds = array<i64: 4, 512>}, {transform_indices = @transform_1, window_bounds = array<i64: 4, 512>}]} {
    %c0 = arith.constant 0 : index
    %c0_0 = arith.constant 0 : index
    %0 = vector.load %arg1[%c0, %c0_0] : memref<4x512xf32, #tpu.memory_space<vmem>>, vector<4x512xf32>
    %1 = math.absf %0 : vector<4x512xf32>
    %cst = arith.constant 0.000000e+00 : f32
    %2 = vector.broadcast %cst : f32 to vector<4x512xf32>
    %3 = arith.subf %2, %1 : vector<4x512xf32>
    %cst_1 = arith.constant 0.000000e+00 : f32
    %4 = vector.broadcast %cst_1 : f32 to vector<4x512xf32>
    %5 = arith.maximumf %0, %4 : vector<4x512xf32>
    %6 = math.exp %3 : vector<4x512xf32>
    %7 = math.log1p %6 : vector<4x512xf32>
    %8 = arith.addf %5, %7 : vector<4x512xf32>
    %c0_2 = arith.constant 0 : index
    %c0_3 = arith.constant 0 : index
    %9 = vector.load %arg2[%c0_2, %c0_3] : memref<4x512xf32, #tpu.memory_space<vmem>>, vector<4x512xf32>
    tpu.vector_store %arg2[%c0_2, %c0_3], %8 {strides = array<i32>} : memref<4x512xf32, #tpu.memory_space<vmem>>, vector<4x512xf32>,
    return
  }
  func.func @transform_0(%arg0: i32) -> (i32, i32) {
    %c0_i32 = arith.constant 0 : i32
    %c0_i32_0 = arith.constant 0 : i32
    return %arg0, %c0_i32 : i32, i32
  }
  func.func @transform_1(%arg0: i32) -> (i32, i32) {
    %c0_i32 = arith.constant 0 : i32
    %c0_i32_0 = arith.constant 0 : i32
    return %arg0, %c0_i32 : i32, i32
  }
}

</mosaic_0001>

<bundles_post_ra>
// kernel: mod_softplus3.1
= control target key start
LH: loop header
LB: loop body
LE: loop exit
PB: predicated region body
PF: predicated region fallthrough
CT: control target
= control target key end

     0   :  { %s76_s0 = inlined_call_operand.vmem [shape: f32[4,512], index: 0, kind: input, shape index: {}]   ;;  %s77_s1 = inlined_call_operand.vmem [shape: f32[4,512], index: 1, kind: output, shape index: {}]  }
   0x1   :  { %v8_v0 = vld [vmem:[%s76_s0] sm:$0xff]  ;;  %v9_v1 = vld [vmem:[%s76_s0 + $0x8] sm:$0xff] }
   0x2   :  { %v10_v2 = vand.u32 2147483647, %v8_v0  ;;  %v11_v3 = vand.u32 2147483647, %v9_v1  ;;  %v14_v20 = vmax.f32 %v8_v0, 0.0  ;;  %v15_v24 = vmax.f32 %v9_v1, 0.0 }
   0x4   :  { %v12_v4 = vsub.f32 0.0, %v10_v2  ;;  %v13_v5 = vsub.f32 0.0, %v11_v3 }
   0x6   :  { %v16_v6 = vmul.f32 1.442695, %v12_v4  ;;  %v18_v7 = vmul.f32 1.442695, %v13_v5 }
   0x8   :  { %46 = vpow2.f32 %v16_v6 }
   0x9   :  { %48 = vpow2.f32 %v18_v7 }
  0x15   :  { %v47_v8 = vpop.eup %46 }
  0x16   :  { %v49_v9 = vpop.eup %48  ;;  %v20_v10 = vadd.f32 1.0, %v47_v8  ;;  %v23_v12 = vmul.f32 -0.5, %v47_v8  ;;  %v26_v15 = vand.u32 2147483647, %v47_v8 }
  0x17   :  { %v29_v11 = vadd.f32 1.0, %v49_v9  ;;  %v32_v13 = vmul.f32 -0.5, %v49_v9  ;;  %v35_v17 = vand.u32 2147483647, %v49_v9 }
  0x18   :  { %50 = vlog2.f32 %v20_v10  ;;  %v24_v14 = vadd.f32 1.0, %v23_v12  ;;  %vm27_vm0 = vcmp.lt.f32.partialorder %v26_v15, 0.0004427343 }
  0x19   :  { %52 = vlog2.f32 %v29_v11  ;;  %v33_v16 = vadd.f32 1.0, %v32_v13  ;;  %vm36_vm1 = vcmp.lt.f32.partialorder %v35_v17, 0.0004427343 }
  0x1a   :  { %v25_v18 = vmul.f32 %v47_v8, %v24_v14 }
  0x1b   :  { %v34_v21 = vmul.f32 %v49_v9, %v33_v16 }
  0x25   :  { %v51_v19 = vpop.eup %50 }
  0x26   :  { %v53_v22 = vpop.eup %52  ;;  %v22_v23 = vmul.f32 0.6931472, %v51_v19 }
  0x27   :  { %v31_v25 = vmul.f32 0.6931472, %v53_v22 }
  0x28   :  { %v28_v26 = vsel %vm27_vm0, %v25_v18, %v22_v23 }
  0x29   :  { %v38_v27 = vadd.f32 %v28_v26, %v14_v20  ;;  %v37_v28 = vsel %vm36_vm1, %v34_v21, %v31_v25 }
  0x2a   :  { %v39_v29 = vadd.f32 %v37_v28, %v15_v24 }
  0x2b   :  { %40 = vst [vmem:[%s77_s1] sm:$0xff] %v38_v27 }
  0x2c   :  { %41 = vst [vmem:[%s77_s1 + $0x8] sm:$0xff] %v39_v29 }

</bundles_post_ra>
